<compile_context>
chip_gen: v5e
topology: v5e:2x2
jax: 0.10.0
libtpu: 0.0.40
codegen_flags: <defaults>
</compile_context>

<pallas_src>
import functools

import jax
import jax.numpy as jnp
from jax.experimental import pallas as pl
from jax.experimental.pallas import tpu as pltpu


def _round_up(x: int, m: int) -> int:
    return (x + m - 1) // m * m


def _largest_aligned_divisor(total_units: int, cap_units: int) -> int:
    """Largest d <= cap_units that divides total_units (units of 128 lanes)."""
    d = max(1, min(cap_units, total_units))
    while total_units % d:
        d -= 1
    return d


# ----------------------------------------------------------------------------
# Kernels
# ----------------------------------------------------------------------------
def _linear_relu_kernel_acc(x_ref, w_ref, b_ref, o_ref, acc_ref):
    """One (tm, tn) output tile, accumulated over the K grid axis."""
    k = pl.program_id(2)

    @pl.when(k == 0)
    def _():
        acc_ref[...] = jnp.zeros_like(acc_ref)

    # MXU matmul on bf16 operands with f32 accumulation.
    acc_ref[...] += jnp.dot(
        x_ref[...], w_ref[...], preferred_element_type=jnp.float32
    )

    # Bias + ReLU epilogue once per output tile, in f32.
    @pl.when(k == pl.num_programs(2) - 1)
    def _():
        y = acc_ref[...] + b_ref[...]          # (tm, tn) + (1, tn) broadcast
        o_ref[...] = jnp.maximum(y, 0.0).astype(o_ref.dtype)


def _linear_relu_kernel_single_k(x_ref, w_ref, b_ref, o_ref):
    """Fast path: whole K reduction in one block -> no accumulator RMW."""
    y = jnp.dot(x_ref[...], w_ref[...], preferred_element_type=jnp.float32)
    o_ref[...] = jnp.maximum(y + b_ref[...], 0.0).astype(o_ref.dtype)


# ----------------------------------------------------------------------------
# One-time parameter preparation (hoisted out of the per-call forward)
# ----------------------------------------------------------------------------
def one_layer_nn_prepare_params(w, b, *, compute_dtype=jnp.bfloat16):
    """Cast + pad Linear weights to the kernel layout ONCE (do at model init).

    w: (in_dim, out_dim)  -- transpose of PyTorch's (out_dim, in_dim)
    b: (out_dim,)
    Returns (wp, bp): wp is (Kp, Np) in compute_dtype, bp is (1, Np) float32,
    with Kp / Np padded up to multiples of 128.
    """
    in_dim, out_dim = w.shape
    Kp = _round_up(in_dim, 128)
    Np = _round_up(out_dim, 128)

    wc = w.astype(compute_dtype)
    bc = b.astype(jnp.float32).reshape(1, -1)
    if (Kp, Np) != (in_dim, out_dim):
        wc = jnp.pad(wc, ((0, Kp - in_dim), (0, Np - out_dim)))
    if Np != out_dim:
        bc = jnp.pad(bc, ((0, 0), (0, Np - out_dim)))
    return wc, bc


# ----------------------------------------------------------------------------
# Forward
# ----------------------------------------------------------------------------
@functools.partial(
    jax.jit, static_argnames=("out_dim", "compute_dtype", "out_dtype")
)
def one_layer_nn_forward(x, wp, bp, *, out_dim,
                         compute_dtype=jnp.bfloat16, out_dtype=jnp.float32):
    """OneLayerNN forward: ReLU(x @ W + b).

    x : (B, in_dim) any float dtype.
    wp, bp : outputs of one_layer_nn_prepare_params (padded, pre-cast).
    Returns (B, out_dim) in out_dtype (float32 by default, matching PyTorch).
    """
    assert x.ndim == 2, "OneLayerNN.forward expects a 2-D input"
    B, in_dim = x.shape
    Kp, Np = wp.shape
    assert Kp == _round_up(in_dim, 128) and Np >= out_dim

    # Mirrors `x = x.float()` -> Linear: single direct cast to the MXU compute
    # dtype (bf16 by default); accumulation is f32 inside the kernel.
    xc = x.astype(compute_dtype)

    # --- Tile selection (tiles are exact divisors of the 128-aligned dims) ---
    tm = min(512, _round_up(B, 16))
    Bp = _round_up(B, tm)
    tk = 128 * _largest_aligned_divisor(Kp // 128, 16)   # <= 2048
    tn = 128 * _largest_aligned_divisor(Np // 128, 8)    # <= 1024

    grid_m = Bp // tm
    # v7x megacore: guarantee >= 2 parallel blocks when possible so both
    # TensorCores get work (no-op on v5e/v6e single-TC chips).
    if grid_m == 1 and Np // tn == 1 and Np % 256 == 0:
        tn = Np // 2
    grid_n = Np // tn
    grid_k = Kp // tk

    # Pad x only if actually misaligned (single jnp.pad, zeros in the K tail
    # so padded columns contribute 0 to the accumulation).
    if Bp != B or Kp != in_dim:
        xc = jnp.pad(xc, ((0, Bp - B), (0, Kp - in_dim)))

    in_bytes = jnp.dtype(compute_dtype).itemsize
    cost = pl.CostEstimate(
        flops=2 * Bp * Kp * Np,
        transcendentals=0,
        bytes_accessed=(Bp * Kp * in_bytes + Kp * Np * in_bytes
                        + Bp * Np * jnp.dtype(out_dtype).itemsize + Np * 4),
    )
    out_shape = jax.ShapeDtypeStruct((Bp, Np), out_dtype)

    if grid_k == 1:
        # Single K step: no accumulator scratch, no init/epilogue gating.
        out = pl.pallas_call(
            _linear_relu_kernel_single_k,
            out_shape=out_shape,
            grid_spec=pltpu.PrefetchScalarGridSpec(
                num_scalar_prefetch=0,
                grid=(grid_m, grid_n),
                in_specs=[
                    pl.BlockSpec((tm, tk), lambda i, j: (i, 0)),
                    pl.BlockSpec((tk, tn), lambda i, j: (0, j)),
                    pl.BlockSpec((1, tn), lambda i, j: (0, j)),
                ],
                out_specs=pl.BlockSpec((tm, tn), lambda i, j: (i, j)),
            ),
            compiler_params=pltpu.CompilerParams(
                dimension_semantics=("parallel", "parallel"),
                vmem_limit_bytes=32 * 1024 * 1024,
            ),
            cost_estimate=cost,
        )(xc, wp, bp)
    else:
        out = pl.pallas_call(
            _linear_relu_kernel_acc,
            out_shape=out_shape,
            grid_spec=pltpu.PrefetchScalarGridSpec(
                num_scalar_prefetch=0,
                grid=(grid_m, grid_n, grid_k),
                in_specs=[
                    pl.BlockSpec((tm, tk), lambda i, j, k: (i, k)),
                    pl.BlockSpec((tk, tn), lambda i, j, k: (k, j)),
                    pl.BlockSpec((1, tn), lambda i, j, k: (0, j)),
                ],
                out_specs=pl.BlockSpec((tm, tn), lambda i, j, k: (i, j)),
                scratch_shapes=[pltpu.VMEM((tm, tn), jnp.float32)],
            ),
            compiler_params=pltpu.CompilerParams(
                dimension_semantics=("parallel", "parallel", "arbitrary"),
                vmem_limit_bytes=32 * 1024 * 1024,
            ),
            cost_estimate=cost,
        )(xc, wp, bp)

    return out[:B, :out_dim]


if __name__ == "__main__":
    # Small, deterministic example consistent with the module:
    # batch=8, in_dim=32, out_dim=100 (the nn.Linear default out_dim).
    # At these tiny shapes the kernel is latency-bound; the tiling pays off
    # at realistic B / in_dim / out_dim.
    key = jax.random.PRNGKey(0)
    kx, kw, kb = jax.random.split(key, 3)

    batch, in_dim, out_dim = 8, 32, 100

    x = jax.random.normal(kx, (batch, in_dim), dtype=jnp.float32)
    # Deterministic init matching nn.Linear's uniform(-1/sqrt(in), 1/sqrt(in)).
    bound = 1.0 / jnp.sqrt(jnp.float32(in_dim))
    w = jax.random.uniform(kw, (in_dim, out_dim), jnp.float32, -bound, bound)
    b = jax.random.uniform(kb, (out_dim,), jnp.float32, -bound, bound)

    # One-time weight prep (done at "model init"), then the jitted forward.
    wp, bp = one_layer_nn_prepare_params(w, b)
    out = one_layer_nn_forward(x, wp, bp, out_dim=out_dim)
    out = jax.block_until_ready(out)

    assert out.shape == (batch, out_dim)
    assert out.dtype == jnp.float32

    # Reference with the same bf16-operand / f32-accumulate numerics.
    ref_bf16 = jnp.maximum(
        jnp.dot(x.astype(jnp.bfloat16), w.astype(jnp.bfloat16),
                preferred_element_type=jnp.float32) + b[None, :],
        0.0,
    )
    assert jnp.allclose(out, ref_bf16, atol=2e-3, rtol=2e-3)

    # Loose check against the full-f32 torch-style reference (bf16 operand
    # rounding makes 1e-5 unattainable by construction).
    ref_f32 = jnp.maximum(x @ w + b[None, :], 0.0)
    assert jnp.allclose(out, ref_f32, atol=5e-2, rtol=5e-2)

    print("KERNEL_OK")
</pallas_src>

<mosaic_0001>
module attributes {stable_mosaic.version = 11 : i64} {
  func.func @_linear_relu_kernel_single_k(%arg0: i32, %arg1: i32, %arg2: memref<16x128xbf16, #tpu.memory_space<vmem>>, %arg3: memref<128x128xbf16, #tpu.memory_space<vmem>>, %arg4: memref<1x128xf32, #tpu.memory_space<vmem>>, %arg5: memref<16x128xf32, #tpu.memory_space<vmem>>) attributes {dimension_semantics = [#tpu.dimension_semantics<parallel>, #tpu.dimension_semantics<parallel>], iteration_bounds = array<i64: 1, 1>, scalar_prefetch = 0 : i64, scratch_operands = 0 : i64, tpu.core_type = #tpu.core_type<tc>, window_params = [{transform_indices = @transform_0, window_bounds = array<i64: 16, 128>}, {transform_indices = @transform_1, window_bounds = array<i64: 128, 128>}, {transform_indices = @transform_2, window_bounds = array<i64: 1, 128>}, {transform_indices = @transform_3, window_bounds = array<i64: 16, 128>}]} {
    %c0 = arith.constant 0 : index
    %c0_0 = arith.constant 0 : index
    %0 = vector.load %arg2[%c0, %c0_0] : memref<16x128xbf16, #tpu.memory_space<vmem>>, vector<16x128xbf16>
    %c0_1 = arith.constant 0 : index
    %c0_2 = arith.constant 0 : index
    %1 = vector.load %arg3[%c0_1, %c0_2] : memref<128x128xbf16, #tpu.memory_space<vmem>>, vector<128x128xbf16>
    %cst = arith.constant dense<0.000000e+00> : vector<16x128xf32>
    %2 = tpu.matmul %0, %1, %cst {dimension_numbers = #tpu.dot_dimension_numbers<[1], [0], [0], [1], [0, 0, 1, 1], [], []>} : vector<16x128xbf16>, vector<128x128xbf16>, vector<16x128xf32> -> vector<16x128xf32>
    %c0_3 = arith.constant 0 : index
    %c0_4 = arith.constant 0 : index
    %3 = vector.load %arg4[%c0_3, %c0_4] : memref<1x128xf32, #tpu.memory_space<vmem>>, vector<1x128xf32>
    %4 = vector.broadcast %3 : vector<1x128xf32> to vector<16x128xf32>
    %5 = arith.addf %2, %4 : vector<16x128xf32>
    %cst_5 = arith.constant 0.000000e+00 : f32
    %6 = vector.broadcast %cst_5 : f32 to vector<16x128xf32>
    %7 = arith.maximumf %5, %6 : vector<16x128xf32>
    %c0_6 = arith.constant 0 : index
    %c0_7 = arith.constant 0 : index
    %8 = vector.load %arg5[%c0_6, %c0_7] : memref<16x128xf32, #tpu.memory_space<vmem>>, vector<16x128xf32>
    tpu.vector_store %arg5[%c0_6, %c0_7], %7 {strides = array<i32>} : memref<16x128xf32, #tpu.memory_space<vmem>>, vector<16x128xf32>,
    return
  }
  func.func @transform_0(%arg0: i32, %arg1: i32) -> (i32, i32) {
    %c0_i32 = arith.constant 0 : i32
    %c0_i32_0 = arith.constant 0 : i32
    return %arg0, %c0_i32 : i32, i32
  }
  func.func @transform_1(%arg0: i32, %arg1: i32) -> (i32, i32) {
    %c0_i32 = arith.constant 0 : i32
    %c0_i32_0 = arith.constant 0 : i32
    return %c0_i32, %arg1 : i32, i32
  }
  func.func @transform_2(%arg0: i32, %arg1: i32) -> (i32, i32) {
    %c0_i32 = arith.constant 0 : i32
    %c0_i32_0 = arith.constant 0 : i32
    return %c0_i32, %arg1 : i32, i32
  }
  func.func @transform_3(%arg0: i32, %arg1: i32) -> (i32, i32) {
    %c0_i32 = arith.constant 0 : i32
    return %arg0, %arg1 : i32, i32
  }
}

</mosaic_0001>

<bundles_post_ra>
// kernel: one_layer_nn_forward.1
= control target key start
LH: loop header
LB: loop body
LE: loop exit
PB: predicated region body
PF: predicated region fallthrough
CT: control target
= control target key end

     0   :  { %8 = vsyncpa [#allocation3], 0  ;;  %s204_s15 = smov [#allocation2]   ;;  %s205_s17 = smov 64   ;;  %s242_s0 = inlined_call_operand.vmem [shape: bf16[16,128], index: 0, kind: input, shape index: {}]   ;;  %s243_s1 = inlined_call_operand.hbm [shape: bf16[128,128], index: 1, kind: input, shape index: {}]   ;;  %s244_s2 = inlined_call_operand.vmem [shape: f32[1,128], index: 2, kind: input, shape index: {}]   ;;  %s245_s3 = inlined_call_operand.vmem [shape: f32[16,128], index: 3, kind: output, shape index: {}]  }
   0x1   :  { %s15_s14 = sshll.u32 %s243_s1, 4  ;;  %s17_s16 = sshll.u32 %s204_s15, 4  ;;  %s16_s14 = int_to_ptr.hbm [resolvable:$true] %s15_s14  ;;  %s18_s16 = int_to_ptr.vmem [resolvable:$true] %s17_s16 }
   0x2   :  { %s206_s18 = smov 4  }
   0x3   :  { %23 = dma.hbm_to_vmem [thread:$0]  %s16_s14, 1024, %s18_s16, [#allocation3], %s205_s17, %s205_s17, %s206_s18  }
   0x4   :  { %202 = dma.done.wait [#allocation3], 1024  }
   0x5   :  { %203 = vsyncadd [#allocation3], 4294966272  ;;  %v173_v0 = vld [vmem:[#allocation2 + $0x38] sm:$0xff]  ;;  %v172_v1 = vld [vmem:[#allocation2 + $0x30] sm:$0xff] }
   0x6   :  { %106 = vmatpush.bf16.msra.mxu0 %v173_v0  ;;  %v171_v2 = vld [vmem:[#allocation2 + $0x28] sm:$0xff]  ;;  %v170_v3 = vld [vmem:[#allocation2 + $0x20] sm:$0xff]  ;;  %v169_v4 = vld [vmem:[#allocation2 + $0x18] sm:$0xff] }
   0x7   :  { %v168_v5 = vld [vmem:[#allocation2 + $0x10] sm:$0xff]  ;;  %v167_v6 = vld [vmem:[#allocation2 + $0x8] sm:$0xff]  ;;  %v166_v7 = vld [vmem:[#allocation2] sm:$0xff] }
   0x8   :  { %v165_v8 = vld [vmem:[%s242_s0] sm:$0xff] }
   0x9   :  { %v177_v9 = vld [vmem:[%s244_s2] ss:$0 sm:$0xff] }
   0xa   :  { %107 = vmatpush.bf16.msra.mxu0 %v172_v1 }
   0xe   :  { %108 = vmatpush.bf16.msra.mxu0 %v171_v2 }
  0x12   :  { %109 = vmatpush.bf16.msra.mxu0 %v170_v3 }
  0x16   :  { %110 = vmatpush.bf16.msra.mxu0 %v169_v4 }
  0x1a   :  { %111 = vmatpush.bf16.msra.mxu0 %v168_v5 }
  0x1e   :  { %112 = vmatpush.bf16.msra.mxu0 %v167_v6 }
  0x22   :  { %113 = vmatpush.bf16.msra.mxu0 %v166_v7 }
  0x25   :  { %114 = vmatmul.bf16.vlgmr.msra.gmra.mxu0 %v165_v8 }
  0xa2   :  { %v115_v10 = vpop.f32.mrf.mxu0 }
  0xa3   :  { %v116_v11 = vadd.f32 %v177_v9, %v115_v10 }
  0xa5   :  { %v120_v12 = vmax.f32 %v116_v11, 0.0 }
  0xa7   :  { %122 = vst [vmem:[%s245_s3] sm:$0xff] %v120_v12 }
  0xaa   :  { %v117_v13 = vpop.f32.mrf.mxu0 }
  0xab   :  { %v118_v14 = vadd.f32 %v177_v9, %v117_v13 }
  0xad   :  { %v121_v15 = vmax.f32 %v118_v14, 0.0 }
  0xaf   :  { %123 = vst [vmem:[%s245_s3 + $0x8] sm:$0xff] %v121_v15 }
  0xb0   :  { %128 = vsyncpa [#allocation3], 1 }

</bundles_post_ra>
